<compile_context>
chip_gen: v7x
topology: tpu7x:2x2x1
jax: 0.10.0
libtpu: 0.0.40
codegen_flags: <defaults>
</compile_context>

<pallas_src>
import functools

import jax
import jax.numpy as jnp
import numpy as np
from jax import lax
from jax.experimental import pallas as pl
from jax.experimental.pallas import tpu as pltpu


def _sigmoid(z):
    # exp and the approximate reciprocal both go to the EUP slot (VALU-free).
    return pl.reciprocal(1.0 + jnp.exp(-z), approx=True)


def _dot_x_wT(x, w):
    # x: (tm, tk), w: (tn, tk)  ->  (tm, tn); contract the last dims of both.
    return lax.dot_general(
        x, w,
        dimension_numbers=(((1,), (1,)), ((), ())),
        preferred_element_type=jnp.float32,
    )


def _linear_sigmoid_single_k_kernel(x_ref, w_ref, b_ref, o_ref):
    """One (tm, tn) output tile, whole K in a single step (fused epilogue)."""
    z = _dot_x_wT(x_ref[...], w_ref[...])
    z = z + b_ref[...].astype(jnp.float32)            # (tm,tn) + (1,tn)
    o_ref[...] = _sigmoid(z).astype(o_ref.dtype)


def _linear_sigmoid_multi_k_kernel(x_ref, w_ref, b_ref, o_ref, acc_ref):
    """One (tm, tn) output tile, accumulating over the K grid axis."""
    k = pl.program_id(2)
    partial = _dot_x_wT(x_ref[...], w_ref[...])

    @pl.when(k == 0)
    def _():
        acc_ref[...] = partial                        # direct write, no zeroing

    @pl.when(k > 0)
    def _():
        acc_ref[...] += partial

    @pl.when(k == pl.num_programs(2) - 1)
    def _():
        z = acc_ref[...] + b_ref[...].astype(jnp.float32)
        o_ref[...] = _sigmoid(z).astype(o_ref.dtype)


def _round_up(a: int, m: int) -> int:
    return (a + m - 1) // m * m


def _pad2d(a: jax.Array, rows: int, cols: int) -> jax.Array:
    r, c = a.shape
    if r == rows and c == cols:
        return a                                       # aligned: no HBM copy
    return jnp.pad(a, ((0, rows - r), (0, cols - c)))


@functools.partial(jax.jit, static_argnames=("tm", "tn", "tk"))
def feature_estimator(x: jax.Array, w: jax.Array, b: jax.Array,
                      *, tm: int = 512, tn: int = 512, tk: int = 1024) -> jax.Array:
    """sigmoid(x @ w.T + b); w kept in torch.nn.Linear layout (out_dim, in_dim)."""
    orig_shape = x.shape
    in_dim = orig_shape[-1]
    x2d = x.reshape(-1, in_dim)

    M, K = x2d.shape
    N, Kw = w.shape
    assert Kw == K, "weight in_dim mismatch"

    # dtype-aware sublane packing: f32 -> 8, bf16 -> 16, int8/fp8 -> 32.
    sub = max(8, 8 * (4 // jnp.dtype(x2d.dtype).itemsize))

    Mp = _round_up(M, sub)
    Kp = _round_up(K, 128)
    Np = _round_up(N, 128)

    # Clamp tiles to the aligned problem. Typical FeatureEstimator in_dims are
    # small, so K usually collapses to a single reduction step.
    tm = min(tm, Mp)
    tk = min(tk, Kp)
    tn = min(tn, Np)

    # v7x megacore: keep at least one "parallel" grid axis with >= 2 blocks.
    if Mp <= tm and Np <= tn and Np >= 2 * 128:
        tn = _round_up(-(-Np // 2), 128)

    # Padded extents must be tile multiples.
    Mp = _round_up(Mp, tm)
    Kp = _round_up(Kp, tk)
    Np = _round_up(Np, tn)

    # Pad only when needed (static checks); W stays (N, K) -> no transpose copy.
    xp = _pad2d(x2d, Mp, Kp)
    wp = _pad2d(w, Np, Kp)
    bp = b.reshape(1, N)
    if Np != N:
        bp = jnp.pad(bp, ((0, 0), (0, Np - N)))

    nk = Kp // tk
    gm, gn = Mp // tm, Np // tn

    compiler_params = pltpu.CompilerParams(
        dimension_semantics=("parallel", "parallel")
        + (("arbitrary",) if nk > 1 else ()),
        # > v5e's 16 MiB scoped default; leaves headroom under v7x's 64 MiB.
        vmem_limit_bytes=48 << 20,
    )

    if nk == 1:
        out_padded = pl.pallas_call(
            _linear_sigmoid_single_k_kernel,
            out_shape=jax.ShapeDtypeStruct((Mp, Np), x.dtype),
            grid_spec=pltpu.PrefetchScalarGridSpec(
                num_scalar_prefetch=0,
                grid=(gm, gn),
                in_specs=[
                    pl.BlockSpec((tm, tk), lambda i, j: (i, 0)),   # x tile
                    pl.BlockSpec((tn, tk), lambda i, j: (j, 0)),   # W tile (N,K)
                    pl.BlockSpec((1, tn), lambda i, j: (0, j)),    # bias tile
                ],
                out_specs=pl.BlockSpec((tm, tn), lambda i, j: (i, j)),
            ),
            compiler_params=compiler_params,
        )(xp, wp, bp)
    else:
        out_padded = pl.pallas_call(
            _linear_sigmoid_multi_k_kernel,
            out_shape=jax.ShapeDtypeStruct((Mp, Np), x.dtype),
            grid_spec=pltpu.PrefetchScalarGridSpec(
                num_scalar_prefetch=0,
                grid=(gm, gn, nk),
                in_specs=[
                    pl.BlockSpec((tm, tk), lambda i, j, k: (i, k)),
                    pl.BlockSpec((tn, tk), lambda i, j, k: (j, k)),
                    pl.BlockSpec((1, tn), lambda i, j, k: (0, j)),
                ],
                out_specs=pl.BlockSpec((tm, tn), lambda i, j, k: (i, j)),
                scratch_shapes=[pltpu.VMEM((tm, tn), jnp.float32)],
            ),
            compiler_params=compiler_params,
        )(xp, wp, bp)

    out = out_padded[:M, :N]
    return out.reshape(*orig_shape[:-1], N)


if __name__ == "__main__":
    key = jax.random.PRNGKey(0)
    kx, kw, kb = jax.random.split(key, 3)

    # Small shapes consistent with the module's forward: x (batch, in_dim).
    batch, in_dim, out_dim = 8, 32, 16
    x = jax.random.normal(kx, (batch, in_dim), dtype=jnp.float32)
    # torch.nn.Linear layout: weight (out_dim, in_dim), bias (out_dim,)
    w = jax.random.normal(kw, (out_dim, in_dim), dtype=jnp.float32) * 0.1
    b = jax.random.normal(kb, (out_dim,), dtype=jnp.float32) * 0.1

    result = feature_estimator(x, w, b)
    result = jax.block_until_ready(result)

    ref = jax.nn.sigmoid(x @ w.T + b)
    np.testing.assert_allclose(np.asarray(result), np.asarray(ref),
                               rtol=2e-3, atol=2e-3)

    # Extra check: exercise the multi-K accumulation path (tk forced small).
    kx2, kw2, kb2 = jax.random.split(jax.random.PRNGKey(1), 3)
    x2 = jax.random.normal(kx2, (16, 384), dtype=jnp.float32)
    w2 = jax.random.normal(kw2, (320, 384), dtype=jnp.float32) * 0.05
    b2 = jax.random.normal(kb2, (320,), dtype=jnp.float32) * 0.05
    result2 = jax.block_until_ready(feature_estimator(x2, w2, b2, tk=128))
    ref2 = jax.nn.sigmoid(x2 @ w2.T + b2)
    np.testing.assert_allclose(np.asarray(result2), np.asarray(ref2),
                               rtol=2e-3, atol=2e-3)

    print("KERNEL_OK")
</pallas_src>

<mosaic_0001>
module attributes {stable_mosaic.version = 11 : i64} {
  func.func @_linear_sigmoid_single_k_kernel(%arg0: i32, %arg1: i32, %arg2: memref<8x128xf32, #tpu.memory_space<vmem>>, %arg3: memref<128x128xf32, #tpu.memory_space<vmem>>, %arg4: memref<1x128xf32, #tpu.memory_space<vmem>>, %arg5: memref<8x128xf32, #tpu.memory_space<vmem>>) attributes {dimension_semantics = [#tpu.dimension_semantics<parallel>, #tpu.dimension_semantics<parallel>], iteration_bounds = array<i64: 1, 1>, scalar_prefetch = 0 : i64, scratch_operands = 0 : i64, tpu.core_type = #tpu.core_type<tc>, window_params = [{transform_indices = @transform_0, window_bounds = array<i64: 8, 128>}, {transform_indices = @transform_1, window_bounds = array<i64: 128, 128>}, {transform_indices = @transform_2, window_bounds = array<i64: 1, 128>}, {transform_indices = @transform_3, window_bounds = array<i64: 8, 128>}]} {
    %c0 = arith.constant 0 : index
    %c0_0 = arith.constant 0 : index
    %0 = vector.load %arg2[%c0, %c0_0] : memref<8x128xf32, #tpu.memory_space<vmem>>, vector<8x128xf32>
    %c0_1 = arith.constant 0 : index
    %c0_2 = arith.constant 0 : index
    %1 = vector.load %arg3[%c0_1, %c0_2] : memref<128x128xf32, #tpu.memory_space<vmem>>, vector<128x128xf32>
    %cst = arith.constant dense<0.000000e+00> : vector<8x128xf32>
    %2 = tpu.matmul %0, %1, %cst {dimension_numbers = #tpu.dot_dimension_numbers<[1], [1], [0], [0], [0, 0, 1, 0], [], []>} : vector<8x128xf32>, vector<128x128xf32>, vector<8x128xf32> -> vector<8x128xf32>
    %c0_3 = arith.constant 0 : index
    %c0_4 = arith.constant 0 : index
    %3 = vector.load %arg4[%c0_3, %c0_4] : memref<1x128xf32, #tpu.memory_space<vmem>>, vector<1x128xf32>
    %4 = vector.broadcast %3 : vector<1x128xf32> to vector<8x128xf32>
    %5 = arith.addf %2, %4 : vector<8x128xf32>
    %cst_5 = arith.constant 0.000000e+00 : f32
    %6 = vector.broadcast %cst_5 : f32 to vector<8x128xf32>
    %7 = arith.subf %6, %5 : vector<8x128xf32>
    %8 = math.exp %7 : vector<8x128xf32>
    %cst_6 = arith.constant 1.000000e+00 : f32
    %9 = vector.broadcast %cst_6 : f32 to vector<8x128xf32>
    %10 = arith.addf %9, %8 : vector<8x128xf32>
    %11 = tpu.reciprocal %10 {approx = true} : vector<8x128xf32> -> vector<8x128xf32>
    %c0_7 = arith.constant 0 : index
    %c0_8 = arith.constant 0 : index
    %12 = vector.load %arg5[%c0_7, %c0_8] : memref<8x128xf32, #tpu.memory_space<vmem>>, vector<8x128xf32>
    tpu.vector_store %arg5[%c0_7, %c0_8], %11 {strides = array<i32>} : memref<8x128xf32, #tpu.memory_space<vmem>>, vector<8x128xf32>,
    return
  }
  func.func @transform_0(%arg0: i32, %arg1: i32) -> (i32, i32) {
    %c0_i32 = arith.constant 0 : i32
    %c0_i32_0 = arith.constant 0 : i32
    return %arg0, %c0_i32 : i32, i32
  }
  func.func @transform_1(%arg0: i32, %arg1: i32) -> (i32, i32) {
    %c0_i32 = arith.constant 0 : i32
    %c0_i32_0 = arith.constant 0 : i32
    return %arg1, %c0_i32 : i32, i32
  }
  func.func @transform_2(%arg0: i32, %arg1: i32) -> (i32, i32) {
    %c0_i32 = arith.constant 0 : i32
    %c0_i32_0 = arith.constant 0 : i32
    return %c0_i32, %arg1 : i32, i32
  }
  func.func @transform_3(%arg0: i32, %arg1: i32) -> (i32, i32) {
    %c0_i32 = arith.constant 0 : i32
    return %arg0, %arg1 : i32, i32
  }
}

</mosaic_0001>

<bundles_post_ra>
// kernel: feature_estimator.1
= control target key start
LH: loop header
LB: loop body
LE: loop exit
PB: predicated region body
PF: predicated region fallthrough
CT: control target
= control target key end

     0   :  { %v238_v2 = vmov 0.0|0.0   ;;  %vm239_vm0 = vmmov 0   ;;  %v240_v4 = vmov 0.0   ;;  %s328_s0 = inlined_call_operand.vmem [shape: f32[8,128], index: 0, kind: input, shape index: {}]   ;;  %s329_s1 = inlined_call_operand.vmem [shape: f32[128,128], index: 1, kind: input, shape index: {}]   ;;  %s330_s2 = inlined_call_operand.vmem [shape: f32[1,128], index: 2, kind: input, shape index: {}]   ;;  %s331_s3 = inlined_call_operand.hbm [shape: f32[8,128], index: 3, kind: output, shape index: {}]  }
   0x1   :  { %v16_v0 = vld [vmem:[%s329_s1] sm:$0xff]  ;;  %v17_v1 = vld [vmem:[%s329_s1 + $0x8] sm:$0xff]  ;;  %182 = vmatprep.subr.bf16.mxu0 %v238_v2  ;;  %179 = vmatprep.mubr.msk.f32.mxu0 %vm239_vm0, %v240_v4  ;;  %v18_v5 = vld [vmem:[%s329_s1 + $0x10] sm:$0xff] }
   0x2   :  { %v183_v3 = vpack.c.bf16 %v17_v1, %v16_v0  ;;  %v19_v6 = vld [vmem:[%s329_s1 + $0x18] sm:$0xff] }
   0x4   :  { %184 = vmatpush3.bf16.xpose.msra.mxu0 %v183_v3 }
   0x5   :  { %185 = vmatprep.subr.bf16.mxu0 %v238_v2 }
   0x6   :  { %8 = vsyncpa [#allocation3], 0  ;;  %v186_v7 = vpack.c.bf16 %v19_v6, %v18_v5  ;;  %v20_v8 = vld [vmem:[%s329_s1 + $0x20] sm:$0xff]  ;;  %v21_v9 = vld [vmem:[%s329_s1 + $0x28] sm:$0xff] }
   0x7   :  { %v189_v10 = vpack.c.bf16 %v21_v9, %v20_v8  ;;  %v22_v11 = vld [vmem:[%s329_s1 + $0x30] sm:$0xff]  ;;  %v23_v12 = vld [vmem:[%s329_s1 + $0x38] sm:$0xff]  ;;  %v24_v14 = vld [vmem:[%s329_s1 + $0x40] sm:$0xff] }
   0x8   :  { %v192_v13 = vpack.c.bf16 %v23_v12, %v22_v11  ;;  %v25_v15 = vld [vmem:[%s329_s1 + $0x48] sm:$0xff]  ;;  %v26_v17 = vld [vmem:[%s329_s1 + $0x50] sm:$0xff]  ;;  %v27_v18 = vld [vmem:[%s329_s1 + $0x58] sm:$0xff] }
   0x9   :  { %v195_v16 = vpack.c.bf16 %v25_v15, %v24_v14  ;;  %v198_v19 = vpack.c.bf16 %v27_v18, %v26_v17  ;;  %v28_v20 = vld [vmem:[%s329_s1 + $0x60] sm:$0xff]  ;;  %v29_v21 = vld [vmem:[%s329_s1 + $0x68] sm:$0xff]  ;;  %v30_v23 = vld [vmem:[%s329_s1 + $0x70] sm:$0xff] }
   0xa   :  { %v201_v22 = vpack.c.bf16 %v29_v21, %v28_v20  ;;  %v31_v24 = vld [vmem:[%s329_s1 + $0x78] sm:$0xff]  ;;  %v15_v26 = vld [vmem:[%s328_s0] sm:$0xff]  ;;  %s241_s1 = smov [#allocation2]  }
   0xb   :  { %v204_v25 = vpack.c.bf16 %v31_v24, %v30_v23  ;;  %v129_v27 = vld [vmem:[%s330_s2] ss:$0 sm:$0xff]  ;;  %s121_s21 = sshll.u32 %s241_s1, 4  ;;  %s122_s21 = int_to_ptr.vmem [resolvable:$true] %s121_s21 }
   0xc   :  { %187 = vmatpush3.bf16.xpose.msra.mxu0 %v186_v7  ;;  %s214_s0 = scalar_lea.vmem %s122_s21, 128  ;;  %p219_p1 = scmp.lt.s32.totalorder %s122_s21, %s122_s21 }
   0xd   :  { %188 = vmatprep.subr.bf16.mxu0 %v238_v2  ;;  %p215_p0 = scmp.ne.s32.totalorder %s122_s21, %s214_s0  ;;  %p220_p2 = scmp.lt.s32.totalorder %s214_s0, %s214_s0 }
   0xf   :  { %p221_p3 = por %p220_p2, %p219_p1 }
  0x11   :  { %p222_p4 = pnand %p221_p3, %p215_p0 }
  0x14   :  { %190 = vmatpush3.bf16.xpose.msra.mxu0 %v189_v10 }
  0x15   :  { %191 = vmatprep.subr.bf16.mxu0 %v238_v2 }
  0x1c   :  { %193 = vmatpush3.bf16.xpose.msra.mxu0 %v192_v13 }
  0x1d   :  { %194 = vmatprep.subr.bf16.mxu0 %v238_v2 }
  0x24   :  { %196 = vmatpush3.bf16.xpose.msra.mxu0 %v195_v16 }
  0x25   :  { %197 = vmatprep.subr.bf16.mxu0 %v238_v2 }
  0x2c   :  { %199 = vmatpush3.bf16.xpose.msra.mxu0 %v198_v19 }
  0x2d   :  { %200 = vmatprep.subr.bf16.mxu0 %v238_v2 }
  0x34   :  { %202 = vmatpush3.bf16.xpose.msra.mxu0 %v201_v22 }
  0x35   :  { %203 = vmatprep.subr.bf16.mxu0 %v238_v2 }
  0x3c   :  { %205 = vmatpush3.bf16.xpose.msra.mxu0 %v204_v25 }
  0x43   :  { %180 = vmatmul.mubr.f32.vlgmr.msra.gmra.mrb[0].mxu0 %v15_v26 }
 0x116   :  { %v105_v28 = vpop.f32.mrb[0].mxu0 }
 0x117   :  { %v106_v29 = vadd.f32 %v129_v27, %v105_v28  ;;  %v181_v30 = vpop.f32.mrb[1].mxu0 }
 0x119   :  { %v109_v31 = vsub.f32 0.0, %v106_v29 }
 0x11b   :  { %v110_v32 = vmul.f32 1.442695, %v109_v31 }
 0x11d   :  { %210 = vpow2.f32 %v110_v32 }
 0x127   :  { %v211_v33 = vpop.eup %210 }
 0x128   :  { %v112_v34 = vadd.f32 1.0, %v211_v33 }
 0x12a   :  { %212 = vrcp.f32 %v112_v34 }
 0x134   :  { %v213_v35 = vpop.eup %212 }
 0x135   :  { %114 = vst [vmem:[#allocation2] sm:$0xff] %v213_v35 }
 0x136   :  { %225 = shalt.err (!%p222_p4)
}
 0x137   :  { %s226_s23 = scalar_lea.hbm %s331_s3, 128 }
 0x138   :  { %p227_p5 = scmp.ne.s32.totalorder %s331_s3, %s226_s23  ;;  %p230_p6 = scmp.lt.u32.totalorder %s226_s23, %s331_s3 }
 0x13a   :  { %p232_p7 = pnand %p230_p6, %p227_p5 }
 0x13c   :  { %235 = shalt.err (!%p232_p7)
}
 0x13d   :  { %124 = dma.vmem_to_hbm [thread:$0]  %s122_s21, 128, %s331_s3, [#allocation3]  }
 0x13e   :  { %236 = dma.done.wait [#allocation3], 128  }
 0x13f   :  { %237 = vsyncadd [#allocation3], 4294967168 }
 0x140   :  { %128 = vsyncpa [#allocation3], 1 }

</bundles_post_ra>
